<compile_context>
chip_gen: v7x
topology: tpu7x:2x2x1
jax: 0.10.0
libtpu: 0.0.40
codegen_flags: <defaults>
</compile_context>

<pallas_src>
import jax
import jax.numpy as jnp
from jax.experimental import pallas as pl
from jax.experimental.pallas import tpu as pltpu


def mlp_kernel(xT_ref, w1_ref, b1_ref, w2_ref, b2_ref, w3_ref, b3_ref, oT_ref):
    xT = xT_ref[...]                                                   # (input_dim, TB)

    # Layer 1: (40, in) @ (in, TB) -> (40, TB); W used in PyTorch (out, in) layout as LHS.
    h1 = jnp.dot(w1_ref[...], xT, preferred_element_type=jnp.float32) + b1_ref[...]
    h1 = jnp.maximum(h1, 0.0)

    # Layer 2: (40, 40) @ (40, TB) -> (40, TB)
    h2 = jnp.dot(w2_ref[...], h1, preferred_element_type=jnp.float32) + b2_ref[...]
    h2 = jnp.maximum(h2, 0.0)

    # Layer 3: (10, 40) @ (40, TB) -> (10, TB)
    logits = jnp.dot(w3_ref[...], h2, preferred_element_type=jnp.float32) + b3_ref[...]

    # Numerically stable softmax over the class axis (axis 0 in this transposed layout).
    m = jnp.max(logits, axis=0, keepdims=True)
    e = jnp.exp(logits - m)
    denom = jnp.sum(e, axis=0, keepdims=True)
    # Exact divide (not approx reciprocal) so each output column sums to 1 to f32 precision.
    oT_ref[...] = (e / denom).astype(oT_ref.dtype)


def _round_up(n, m):
    return ((n + m - 1) // m) * m


def my_module_forward(x, params, *, batch_tile=1024):
    """x: (B, input_dim) float32. params: PyTorch-layout weights W: (out, in), b: (out,)."""
    B, input_dim = x.shape
    w1, b1 = params["w1"], params["b1"]
    w2, b2 = params["w2"], params["b2"]
    w3, b3 = params["w3"], params["b3"]
    out_dim = w3.shape[0]

    # Biases as (out, 1) 2-D tiles: clean (sublane, lane) layout, broadcast along lanes.
    b1c = b1.reshape(-1, 1)
    b2c = b2.reshape(-1, 1)
    b3c = b3.reshape(-1, 1)

    # Feature-major input: batch on the lane (last) axis.
    xT = x.T                                                           # (input_dim, B)

    # Batch tile on the lane axis: either the full batch (single step, block == full array
    # satisfies the (8,128) rule) or a multiple of 128. For B > 256 force >= 2 grid steps
    # so both v7x TensorCores run; larger tiles amortize the ~0.35us/step overhead.
    if B <= 256:
        TB = B
    else:
        TB = min(batch_tile, _round_up(pl.cdiv(B, 2), 128))
    grid = (pl.cdiv(B, TB),)

    resident = lambda i: (0, 0)  # same block every step -> pinned in VMEM across the grid
    in_specs = [
        pl.BlockSpec((input_dim, TB), lambda i: (0, i)),
        pl.BlockSpec(w1.shape, resident),
        pl.BlockSpec(b1c.shape, resident),
        pl.BlockSpec(w2.shape, resident),
        pl.BlockSpec(b2c.shape, resident),
        pl.BlockSpec(w3.shape, resident),
        pl.BlockSpec(b3c.shape, resident),
    ]
    out_specs = pl.BlockSpec((out_dim, TB), lambda i: (0, i))

    outT = pl.pallas_call(
        mlp_kernel,
        out_shape=jax.ShapeDtypeStruct((out_dim, B), jnp.float32),
        grid=grid,
        in_specs=in_specs,
        out_specs=out_specs,
        compiler_params=pltpu.CompilerParams(
            dimension_semantics=("parallel",),  # megacore split of the batch grid on v7x
        ),
    )(xT, w1, b1c, w2, b2c, w3, b3c)

    return outT.T                                                      # (B, out_dim)


def init_params(key, input_dim):
    """Deterministic init mirroring torch.nn.Linear default (uniform +-1/sqrt(fan_in))."""
    def linear_init(k, fan_in, fan_out):
        kw, kb = jax.random.split(k)
        bound = 1.0 / jnp.sqrt(fan_in)
        w = jax.random.uniform(kw, (fan_out, fan_in), jnp.float32, -bound, bound)
        b = jax.random.uniform(kb, (fan_out,), jnp.float32, -bound, bound)
        return w, b

    k1, k2, k3 = jax.random.split(key, 3)
    w1, b1 = linear_init(k1, input_dim, 40)
    w2, b2 = linear_init(k2, 40, 40)
    w3, b3 = linear_init(k3, 40, 10)
    return {"w1": w1, "b1": b1, "w2": w2, "b2": b2, "w3": w3, "b3": b3}


def reference_forward(x, params):
    h1 = jnp.maximum(x @ params["w1"].T + params["b1"], 0.0)
    h2 = jnp.maximum(h1 @ params["w2"].T + params["b2"], 0.0)
    logits = h2 @ params["w3"].T + params["b3"]
    return jax.nn.softmax(logits, axis=1)


if __name__ == "__main__":
    key = jax.random.PRNGKey(0)
    kx, kp = jax.random.split(key)

    batch_size, input_dim = 16, 32
    x = jax.random.normal(kx, (batch_size, input_dim), jnp.float32)
    params = init_params(kp, input_dim)

    # Small batch: single-step grid (block == full array extents).
    out = jax.block_until_ready(my_module_forward(x, params))
    ref = reference_forward(x, params)
    assert out.shape == (batch_size, 10)
    assert jnp.allclose(out, ref, atol=1e-3, rtol=1e-3)
    assert jnp.allclose(jnp.sum(out, axis=1), 1.0, atol=1e-5)

    # Larger batch: exercises the tiled / pipelined path (2 grid steps of 256 lanes each).
    x_big = jax.random.normal(kx, (512, input_dim), jnp.float32)
    out_big = jax.block_until_ready(my_module_forward(x_big, params, batch_tile=256))
    ref_big = reference_forward(x_big, params)
    assert out_big.shape == (512, 10)
    assert jnp.allclose(out_big, ref_big, atol=1e-3, rtol=1e-3)
    assert jnp.allclose(jnp.sum(out_big, axis=1), 1.0, atol=1e-5)

    print("KERNEL_OK")
</pallas_src>

<mosaic_0001>
module attributes {stable_mosaic.version = 11 : i64} {
  func.func @mlp_kernel(%arg0: i32, %arg1: memref<32x16xf32, #tpu.memory_space<vmem>>, %arg2: memref<40x32xf32, #tpu.memory_space<vmem>>, %arg3: memref<40x1xf32, #tpu.memory_space<vmem>>, %arg4: memref<40x40xf32, #tpu.memory_space<vmem>>, %arg5: memref<40x1xf32, #tpu.memory_space<vmem>>, %arg6: memref<10x40xf32, #tpu.memory_space<vmem>>, %arg7: memref<10x1xf32, #tpu.memory_space<vmem>>, %arg8: memref<10x16xf32, #tpu.memory_space<vmem>>) attributes {dimension_semantics = [#tpu.dimension_semantics<parallel>], iteration_bounds = array<i64: 1>, scalar_prefetch = 0 : i64, scratch_operands = 0 : i64, tpu.core_type = #tpu.core_type<tc>, window_params = [{transform_indices = @transform_0, window_bounds = array<i64: 32, 16>}, {pipeline_mode = #tpu.pipeline_mode<synchronous>, transform_indices = @transform_1, window_bounds = array<i64: 40, 32>}, {pipeline_mode = #tpu.pipeline_mode<synchronous>, transform_indices = @transform_2, window_bounds = array<i64: 40, 1>}, {pipeline_mode = #tpu.pipeline_mode<synchronous>, transform_indices = @transform_3, window_bounds = array<i64: 40, 40>}, {pipeline_mode = #tpu.pipeline_mode<synchronous>, transform_indices = @transform_4, window_bounds = array<i64: 40, 1>}, {pipeline_mode = #tpu.pipeline_mode<synchronous>, transform_indices = @transform_5, window_bounds = array<i64: 10, 40>}, {pipeline_mode = #tpu.pipeline_mode<synchronous>, transform_indices = @transform_6, window_bounds = array<i64: 10, 1>}, {transform_indices = @transform_7, window_bounds = array<i64: 10, 16>}]} {
    %c0 = arith.constant 0 : index
    %c0_0 = arith.constant 0 : index
    %0 = vector.load %arg1[%c0, %c0_0] : memref<32x16xf32, #tpu.memory_space<vmem>>, vector<32x16xf32>
    %c0_1 = arith.constant 0 : index
    %c0_2 = arith.constant 0 : index
    %1 = vector.load %arg2[%c0_1, %c0_2] : memref<40x32xf32, #tpu.memory_space<vmem>>, vector<40x32xf32>
    %cst = arith.constant dense<0.000000e+00> : vector<40x16xf32>
    %2 = tpu.matmul %1, %0, %cst {dimension_numbers = #tpu.dot_dimension_numbers<[1], [0], [0], [1], [0, 0, 1, 1], [], []>} : vector<40x32xf32>, vector<32x16xf32>, vector<40x16xf32> -> vector<40x16xf32>
    %c0_3 = arith.constant 0 : index
    %c0_4 = arith.constant 0 : index
    %3 = vector.load %arg3[%c0_3, %c0_4] : memref<40x1xf32, #tpu.memory_space<vmem>>, vector<40x1xf32>
    %4 = vector.broadcast %3 : vector<40x1xf32> to vector<40x16xf32>
    %5 = arith.addf %2, %4 : vector<40x16xf32>
    %cst_5 = arith.constant 0.000000e+00 : f32
    %6 = vector.broadcast %cst_5 : f32 to vector<40x16xf32>
    %7 = arith.maximumf %5, %6 : vector<40x16xf32>
    %c0_6 = arith.constant 0 : index
    %c0_7 = arith.constant 0 : index
    %8 = vector.load %arg4[%c0_6, %c0_7] : memref<40x40xf32, #tpu.memory_space<vmem>>, vector<40x40xf32>
    %cst_8 = arith.constant dense<0.000000e+00> : vector<40x16xf32>
    %9 = tpu.matmul %8, %7, %cst_8 {dimension_numbers = #tpu.dot_dimension_numbers<[1], [0], [0], [1], [0, 0, 1, 1], [], []>} : vector<40x40xf32>, vector<40x16xf32>, vector<40x16xf32> -> vector<40x16xf32>
    %c0_9 = arith.constant 0 : index
    %c0_10 = arith.constant 0 : index
    %10 = vector.load %arg5[%c0_9, %c0_10] : memref<40x1xf32, #tpu.memory_space<vmem>>, vector<40x1xf32>
    %11 = vector.broadcast %10 : vector<40x1xf32> to vector<40x16xf32>
    %12 = arith.addf %9, %11 : vector<40x16xf32>
    %cst_11 = arith.constant 0.000000e+00 : f32
    %13 = vector.broadcast %cst_11 : f32 to vector<40x16xf32>
    %14 = arith.maximumf %12, %13 : vector<40x16xf32>
    %c0_12 = arith.constant 0 : index
    %c0_13 = arith.constant 0 : index
    %15 = vector.load %arg6[%c0_12, %c0_13] : memref<10x40xf32, #tpu.memory_space<vmem>>, vector<10x40xf32>
    %cst_14 = arith.constant dense<0.000000e+00> : vector<10x16xf32>
    %16 = tpu.matmul %15, %14, %cst_14 {dimension_numbers = #tpu.dot_dimension_numbers<[1], [0], [0], [1], [0, 0, 1, 1], [], []>} : vector<10x40xf32>, vector<40x16xf32>, vector<10x16xf32> -> vector<10x16xf32>
    %c0_15 = arith.constant 0 : index
    %c0_16 = arith.constant 0 : index
    %17 = vector.load %arg7[%c0_15, %c0_16] : memref<10x1xf32, #tpu.memory_space<vmem>>, vector<10x1xf32>
    %18 = vector.broadcast %17 : vector<10x1xf32> to vector<10x16xf32>
    %19 = arith.addf %16, %18 : vector<10x16xf32>
    %cst_17 = arith.constant dense<0xFF800000> : vector<16xf32>
    %20 = vector.multi_reduction <maximumf>, %19, %cst_17 [0] : vector<10x16xf32> to vector<16xf32>
    %21 = vector.shape_cast %20 : vector<16xf32> to vector<1x16xf32>
    %22 = vector.broadcast %21 : vector<1x16xf32> to vector<10x16xf32>
    %23 = arith.subf %19, %22 : vector<10x16xf32>
    %24 = math.exp %23 : vector<10x16xf32>
    %cst_18 = arith.constant dense<0.000000e+00> : vector<16xf32>
    %25 = vector.multi_reduction <add>, %24, %cst_18 [0] : vector<10x16xf32> to vector<16xf32>
    %26 = vector.shape_cast %25 : vector<16xf32> to vector<1x16xf32>
    %27 = vector.broadcast %26 : vector<1x16xf32> to vector<10x16xf32>
    %28 = arith.divf %24, %27 : vector<10x16xf32>
    %c0_19 = arith.constant 0 : index
    %c0_20 = arith.constant 0 : index
    %29 = vector.load %arg8[%c0_19, %c0_20] : memref<10x16xf32, #tpu.memory_space<vmem>>, vector<10x16xf32>
    tpu.vector_store %arg8[%c0_19, %c0_20], %28 {strides = array<i32>} : memref<10x16xf32, #tpu.memory_space<vmem>>, vector<10x16xf32>,
    return
  }
  func.func @transform_0(%arg0: i32) -> (i32, i32) {
    %c0_i32 = arith.constant 0 : i32
    %c0_i32_0 = arith.constant 0 : i32
    return %c0_i32, %arg0 : i32, i32
  }
  func.func @transform_1(%arg0: i32) -> (i32, i32) {
    %c0_i32 = arith.constant 0 : i32
    %c0_i32_0 = arith.constant 0 : i32
    %c0_i32_1 = arith.constant 0 : i32
    return %c0_i32, %c0_i32_0 : i32, i32
  }
  func.func @transform_2(%arg0: i32) -> (i32, i32) {
    %c0_i32 = arith.constant 0 : i32
    %c0_i32_0 = arith.constant 0 : i32
    %c0_i32_1 = arith.constant 0 : i32
    return %c0_i32, %c0_i32_0 : i32, i32
  }
  func.func @transform_3(%arg0: i32) -> (i32, i32) {
    %c0_i32 = arith.constant 0 : i32
    %c0_i32_0 = arith.constant 0 : i32
    %c0_i32_1 = arith.constant 0 : i32
    return %c0_i32, %c0_i32_0 : i32, i32
  }
  func.func @transform_4(%arg0: i32) -> (i32, i32) {
    %c0_i32 = arith.constant 0 : i32
    %c0_i32_0 = arith.constant 0 : i32
    %c0_i32_1 = arith.constant 0 : i32
    return %c0_i32, %c0_i32_0 : i32, i32
  }
  func.func @transform_5(%arg0: i32) -> (i32, i32) {
    %c0_i32 = arith.constant 0 : i32
    %c0_i32_0 = arith.constant 0 : i32
    %c0_i32_1 = arith.constant 0 : i32
    return %c0_i32, %c0_i32_0 : i32, i32
  }
  func.func @transform_6(%arg0: i32) -> (i32, i32) {
    %c0_i32 = arith.constant 0 : i32
    %c0_i32_0 = arith.constant 0 : i32
    %c0_i32_1 = arith.constant 0 : i32
    return %c0_i32, %c0_i32_0 : i32, i32
  }
  func.func @transform_7(%arg0: i32) -> (i32, i32) {
    %c0_i32 = arith.constant 0 : i32
    %c0_i32_0 = arith.constant 0 : i32
    return %c0_i32, %arg0 : i32, i32
  }
}

</mosaic_0001>

<bundles_post_ra>
// kernel: tpu_custom_call.1
= control target key start
LH: loop header
LB: loop body
LE: loop exit
PB: predicated region body
PF: predicated region fallthrough
CT: control target
= control target key end

     0   :  { %v623_v3 = vmov 0.0|0.0   ;;  %vm624_vm0 = vmmov 0   ;;  %v625_v6 = vmov 0.0   ;;  %v626_v7 = vmov 0   ;;  %s809_s0 = inlined_call_operand.vmem [shape: f32[32,16], index: 0, kind: input, shape index: {}]   ;;  %s810_s1 = inlined_call_operand.vmem [shape: f32[40,32], index: 1, kind: input, shape index: {}]   ;;  %s811_s2 = inlined_call_operand.vmem [shape: f32[40,1], index: 2, kind: input, shape index: {}]   ;;  %s812_s3 = inlined_call_operand.vmem [shape: f32[40,40], index: 3, kind: input, shape index: {}]   ;;  %s813_s4 = inlined_call_operand.vmem [shape: f32[40,1], index: 4, kind: input, shape index: {}]   ;;  %s814_s5 = inlined_call_operand.vmem [shape: f32[10,40], index: 5, kind: input, shape index: {}]   ;;  %s815_s6 = inlined_call_operand.vmem [shape: f32[10,1], index: 6, kind: input, shape index: {}]   ;;  %s816_s7 = inlined_call_operand.hbm [shape: f32[10,16], index: 7, kind: output, shape index: {}]  }
   0x1   :  { %v27_v0 = vld [vmem:[%s809_s0] sm:$0xff]  ;;  %v28_v1 = vld [vmem:[%s809_s0 + $0x8] sm:$0xff]  ;;  %v29_v2 = vld [vmem:[%s809_s0 + $0x10] sm:$0xff]  ;;  %564 = vmatprep.subr.bf16.mxu0 %v623_v3  ;;  %511 = vmatprep.mubr.msk.f32.mxu0 %vm624_vm0, %v625_v6  ;;  %vm66_vm1 = vcmask 261120  }
   0x2   :  { %v565_v4 = vpack.c.bf16 %v28_v1, %v27_v0  ;;  %v30_v5 = vld [vmem:[%s809_s0 + $0x18] sm:$0xff]  ;;  %591 = vset.pattern.permute.xlu0 %v626_v7  ;;  %592 = vset.pattern.permute.xlu1 %v626_v7  ;;  %v36_v9 = vld [vmem:[%s811_s2] sm:$0xff]  ;;  %v38_v10 = vld [vmem:[%s811_s2 + $0x10] sm:$0xff] }
   0x3   :  { %v568_v8 = vpack.c.bf16 %v30_v5, %v29_v2  ;;  %570 = vmatprep.subr.bf16.mxu1 %v623_v3  ;;  %43 = vperm.xlu0 %591, %v36_v9   ;;  %v37_v11 = vld [vmem:[%s811_s2 + $0x8] sm:$0xff]  ;;  %v39_v12 = vld [vmem:[%s811_s2 + $0x18] sm:$0xff]  ;;  %v31_v13 = vld [vmem:[%s810_s1] sm:$0xff] }
   0x4   :  { %566 = vmatpush3.bf16.msra.mxu0 %v565_v4  ;;  %53 = vperm.xlu1 %592, %v38_v10  }
   0x5   :  { %567 = vmatprep.subr.bf16.mxu0 %v623_v3  ;;  %536 = vmatprep.mubr.msk.f32.mxu1 %vm624_vm0, %v625_v6 }
   0x8   :  { %569 = vmatpush3.bf16.msra.mxu0 %v568_v8 }
   0x9   :  { %12 = vsyncpa [#allocation3], 0  ;;  %48 = vperm.xlu0 %591, %v37_v11   ;;  %58 = vperm.xlu1 %592, %v39_v12   ;;  %v40_v14 = vld [vmem:[%s811_s2 + $0x20] sm:$0xff]  ;;  %v32_v16 = vld [vmem:[%s810_s1 + $0x8] sm:$0xff]  ;;  %vm212_vm2 = vcmask 326656   ;;  %vm420_vm3 = vcmask 123904  }
   0xa   :  { %v182_v15 = vld [vmem:[%s813_s4] sm:$0xff]  ;;  %v183_v17 = vld [vmem:[%s813_s4 + $0x8] sm:$0xff]  ;;  %v184_v18 = vld [vmem:[%s813_s4 + $0x10] sm:$0xff]  ;;  %vm418_vm4 = vcmask 130048  }
   0xb   :  { %512 = vmatmul.mubr.msk.f32.vlgmr.msra.gmra.mrb[0].mxu0 %vm66_vm1, %v31_v13  ;;  %v33_v19 = vld [vmem:[%s810_s1 + $0x10] sm:$0xff]  ;;  %v185_v20 = vld [vmem:[%s813_s4 + $0x18] sm:$0xff]  ;;  %v186_v21 = vld [vmem:[%s813_s4 + $0x20] sm:$0xff] }
   0xc   :  { %514 = vmatprep.mubr.msk.f32.mxu0 %vm624_vm0, %v625_v6  ;;  %v34_v22 = vld [vmem:[%s810_s1 + $0x18] sm:$0xff]  ;;  %v325_v23 = vld [vmem:[%s815_s6] sm:$0xff]  ;;  %v326_v24 = vld [vmem:[%s815_s6 + $0x8] sm:$0x3] }
   0xd   :  { %63 = vperm.xlu0 %591, %v40_v14   ;;  %189 = vperm.xlu1 %592, %v182_v15   ;;  %v35_v25 = vld [vmem:[%s810_s1 + $0x20] sm:$0xff]  ;;  %v178_v54 = vld [vmem:[%s812_s3 + $0x8] sm:$0xff]  ;;  %v179_v55 = vld [vmem:[%s812_s3 + $0x10] sm:$0xff] }
   0xe   :  { %v177_v53 = vld [vmem:[%s812_s3] sm:$0xff]  ;;  %v180_v56 = vld [vmem:[%s812_s3 + $0x18] sm:$0xff] }
   0xf   :  { %515 = vmatmul.mubr.msk.f32.gmra.mrb[2].mxu0 %vm66_vm1, %v32_v16  ;;  %v181_v57 = vld [vmem:[%s812_s3 + $0x20] sm:$0xff] }
  0x10   :  { %517 = vmatprep.mubr.msk.f32.mxu0 %vm624_vm0, %v625_v6  ;;  %v323_v58 = vld [vmem:[%s814_s5] sm:$0xff] }
  0x11   :  { %194 = vperm.xlu0 %591, %v183_v17   ;;  %199 = vperm.xlu1 %592, %v184_v18  }
  0x13   :  { %518 = vmatmul.mubr.msk.f32.gmra.mrb[4].mxu0 %vm66_vm1, %v33_v19 }
  0x14   :  { %520 = vmatprep.mubr.msk.f32.mxu0 %vm624_vm0, %v625_v6 }
  0x15   :  { %204 = vperm.xlu0 %591, %v185_v20   ;;  %209 = vperm.xlu1 %592, %v186_v21  }
  0x17   :  { %521 = vmatmul.mubr.msk.f32.gmra.mrb[6].mxu0 %vm66_vm1, %v34_v22  ;;  %v324_v22 = vld [vmem:[%s814_s5 + $0x8] sm:$0x3]  ;;  %s627_s5 = smov [#allocation2]  }
  0x18   :  { %523 = vmatprep.mubr.msk.f32.mxu0 %vm624_vm0, %v625_v6  ;;  %s454_s26 = sshll.u32 %s627_s5, 4  ;;  %s455_s26 = int_to_ptr.vmem [resolvable:$true] %s454_s26 }
  0x19   :  { %329 = vperm.xlu0 %591, %v325_v23   ;;  %334 = vperm.xlu1 %592, %v326_v24   ;;  %s599_s27 = scalar_lea.vmem %s455_s26, 256  ;;  %p604_p1 = scmp.lt.s32.totalorder %s455_s26, %s455_s26 }
  0x1a   :  { %p600_p0 = scmp.ne.s32.totalorder %s455_s26, %s599_s27  ;;  %p605_p2 = scmp.lt.s32.totalorder %s599_s27, %s599_s27 }
  0x1b   :  { %524 = vmatmul.mubr.msk.f32.gmra.mrb[8].mxu0 %vm66_vm1, %v35_v25 }
  0x1c   :  { %561 = vmatprep.mubr.msk.f32.mxu0 %vm212_vm2, %v323_v58  ;;  %p606_p3 = por %p605_p2, %p604_p1 }
  0x1e   :  { %p607_p4 = pnand %p606_p3, %p600_p0 }
  0x82   :  { %v44_v26 = vpop.permute.xlu0 %43 }
  0x83   :  { %v54_v34 = vpop.permute.xlu1 %53 }
  0x88   :  { %v49_v30 = vpop.permute.xlu0 %48  ;;  %v59_v41 = vpop.permute.xlu1 %58 }
  0x8c   :  { %v64_v47 = vpop.permute.xlu0 %63  ;;  %v190_v61 = vpop.permute.xlu1 %189 }
  0x90   :  { %v195_v63 = vpop.permute.xlu0 %194  ;;  %v200_v8 = vpop.permute.xlu1 %199 }
  0x94   :  { %v205_v10 = vpop.permute.xlu0 %204  ;;  %v210_v16 = vpop.permute.xlu1 %209 }
  0x98   :  { %v335_v23 = vpop.permute.xlu1 %334  ;;  %v330_v25 = vpop.permute.xlu0 %329 }
  0xde   :  { %v148_v27 = vpop.f32.mrb[0].mxu0 }
  0xdf   :  { %v513_v28 = vpop.f32.mrb[1].mxu0  ;;  %v149_v29 = vadd.f32 %v148_v27, %v44_v26 }
  0xe1   :  { %v172_v35 = vmax.f32 %v149_v29, 0.0 }
  0xe2   :  { %v153_v31 = vpop.f32.mrb[2].mxu0 }
  0xe3   :  { %v154_v32 = vadd.f32 %v153_v31, %v49_v30  ;;  %v516_v33 = vpop.f32.mrb[3].mxu0 }
  0xe5   :  { %v173_v36 = vmax.f32 %v154_v32, 0.0 }
  0xe6   :  { %v158_v37 = vpop.f32.mrb[4].mxu0 }
  0xe7   :  { %v519_v38 = vpop.f32.mrb[5].mxu0  ;;  %v571_v39 = vpack.c.bf16 %v173_v36, %v172_v35  ;;  %v159_v40 = vadd.f32 %v158_v37, %v54_v34 }
  0xe9   :  { %572 = vmatpush3.bf16.msra.mxu1 %v571_v39  ;;  %v174_v45 = vmax.f32 %v159_v40, 0.0 }
  0xea   :  { %v163_v42 = vpop.f32.mrb[6].mxu0  ;;  %573 = vmatprep.subr.bf16.mxu1 %v623_v3 }
  0xeb   :  { %v164_v43 = vadd.f32 %v163_v42, %v59_v41  ;;  %v522_v44 = vpop.f32.mrb[7].mxu0 }
  0xed   :  { %v175_v46 = vmax.f32 %v164_v43, 0.0 }
  0xee   :  { %v168_v48 = vpop.f32.mrb[8].mxu0 }
  0xef   :  { %v574_v49 = vpack.c.bf16 %v175_v46, %v174_v45  ;;  %v169_v50 = vadd.f32 %v168_v48, %v64_v47  ;;  %v525_v51 = vpop.f32.mrb[9].mxu0 }
  0xf1   :  { %575 = vmatpush3.bf16.msra.mxu1 %v574_v49  ;;  %v176_v52 = vmax.f32 %v169_v50, 0.0 }
  0xf2   :  { %534 = vmatprep.subr.mxu1 %v625_v6 }
  0xf5   :  { %535 = vmatpush3.msra.mxu1 %v176_v52 }
  0xf6   :  { %537 = vmatmul.mubr.msk.f32.vlgmr.msra.gmra.mrb[0].mxu1 %vm212_vm2, %v177_v53 }
  0xf7   :  { %539 = vmatprep.mubr.msk.f32.mxu1 %vm624_vm0, %v625_v6 }
  0xfa   :  { %540 = vmatmul.mubr.msk.f32.gmra.mrb[2].mxu1 %vm212_vm2, %v178_v54 }
  0xfb   :  { %542 = vmatprep.mubr.msk.f32.mxu1 %vm624_vm0, %v625_v6 }
  0xfe   :  { %543 = vmatmul.mubr.msk.f32.gmra.mrb[4].mxu1 %vm212_vm2, %v179_v55 }
  0xff   :  { %545 = vmatprep.mubr.msk.f32.mxu1 %vm624_vm0, %v625_v6 }
 0x102   :  { %546 = vmatmul.mubr.msk.f32.gmra.mrb[6].mxu1 %vm212_vm2, %v180_v56 }
 0x103   :  { %548 = vmatprep.mubr.msk.f32.mxu1 %vm624_vm0, %v625_v6 }
 0x106   :  { %549 = vmatmul.mubr.msk.f32.gmra.mrb[8].mxu1 %vm212_vm2, %v181_v57 }
 0x1c9   :  { %v294_v59 = vpop.f32.mrb[0].mxu1 }
 0x1ca   :  { %v538_v60 = vpop.f32.mrb[1].mxu1  ;;  %v295_v62 = vadd.f32 %v294_v59, %v190_v61 }
 0x1cc   :  { %v318_v3 = vmax.f32 %v295_v62, 0.0 }
 0x1cd   :  { %v299_v0 = vpop.f32.mrb[2].mxu1 }
 0x1ce   :  { %v300_v1 = vadd.f32 %v299_v0, %v195_v63  ;;  %v541_v2 = vpop.f32.mrb[3].mxu1 }
 0x1d0   :  { %v319_v4 = vmax.f32 %v300_v1, 0.0 }
 0x1d1   :  { %v304_v5 = vpop.f32.mrb[4].mxu1 }
 0x1d2   :  { %v576_v6 = vpack.c.bf16 %v319_v4, %v318_v3  ;;  %v544_v7 = vpop.f32.mrb[5].mxu1  ;;  %v305_v9 = vadd.f32 %v304_v5, %v200_v8 }
 0x1d4   :  { %577 = vmatprep.subr.bf16.mxu0 %v576_v6  ;;  %v320_v14 = vmax.f32 %v305_v9, 0.0 }
 0x1d5   :  { %v309_v11 = vpop.f32.mrb[6].mxu1  ;;  %579 = vmatpush3.bf16.msra.mxu0 %v576_v6 }
 0x1d6   :  { %v310_v12 = vadd.f32 %v309_v11, %v205_v10  ;;  %v547_v13 = vpop.f32.mrb[7].mxu1 }
 0x1d8   :  { %v321_v15 = vmax.f32 %v310_v12, 0.0 }
 0x1d9   :  { %v314_v17 = vpop.f32.mrb[8].mxu1 }
 0x1da   :  { %v580_v18 = vpack.c.bf16 %v321_v15, %v320_v14  ;;  %v315_v19 = vadd.f32 %v314_v17, %v210_v16  ;;  %v550_v20 = vpop.f32.mrb[9].mxu1 }
 0x1dc   :  { %v322_v21 = vmax.f32 %v315_v19, 0.0  ;;  %581 = vmatprep.subr.bf16.mxu0 %v580_v18 }
 0x1dd   :  { %583 = vmatpush3.bf16.msra.mxu0 %v580_v18 }
 0x1de   :  { %559 = vmatprep.subr.mxu0 %v322_v21 }
 0x1e1   :  { %560 = vmatpush3.msra.mxu0 %v322_v21 }
 0x1e2   :  { %562 = vmatmul.mubr.msk.f32.vlgmr.msra.gmra.mrb[10].mxu0 %vm212_vm2, %v324_v22 }
 0x2b5   :  { %v563_v24 = vpop.f32.mrb[10].mxu0 }
 0x2b6   :  { %v415_v26 = vadd.f32 %v563_v24, %v335_v23  ;;  %v409_v27 = vpop.f32.mrb[11].mxu0 }
 0x2b7   :  { %v410_v28 = vadd.f32 %v409_v27, %v330_v25 }
 0x2b8   :  { %v421_v29 = vsel %vm420_vm3, %v415_v26, -inf }
 0x2b9   :  { %v419_v30 = vsel %vm418_vm4, %v410_v28, -inf }
 0x2ba   :  { %v422_v31 = vmax.f32 %v419_v30, %v421_v29 }
 0x2bc   :  { %v423_v32 = vrot.slane %v422_v31, 4 }
 0x2be   :  { %v424_v33 = vmax.f32 %v422_v31, %v423_v32 }
 0x2c0   :  { %v425_v34 = vrot.slane %v424_v33, 2 }
 0x2c2   :  { %v426_v35 = vmax.f32 %v424_v33, %v425_v34 }
 0x2c4   :  { %v427_v36 = vrot.slane %v426_v35, 1 }
 0x2c6   :  { %v428_v37 = vmax.f32 %v426_v35, %v427_v36 }
 0x2c8   :  { %v429_v38 = vsub.f32 %v410_v28, %v428_v37  ;;  %v430_v39 = vsub.f32 %v415_v26, %v428_v37 }
 0x2ca   :  { %v431_v40 = vmul.f32 1.442695, %v429_v38  ;;  %v433_v41 = vmul.f32 1.442695, %v430_v39 }
 0x2cc   :  { %593 = vpow2.f32 %v431_v40 }
 0x2cd   :  { %595 = vpow2.f32 %v433_v41 }
 0x2d6   :  { %v594_v42 = vpop.eup %593 }
 0x2d7   :  { %v596_v43 = vpop.eup %595  ;;  %v435_v44 = vsel %vm418_vm4, %v594_v42, 0.0 }
 0x2d8   :  { %v436_v45 = vsel %vm420_vm3, %v596_v43, 0.0 }
 0x2d9   :  { %v437_v46 = vadd.f32 %v436_v45, %v435_v44 }
 0x2db   :  { %v438_v47 = vrot.slane %v437_v46, 4 }
 0x2dd   :  { %v439_v48 = vadd.f32 %v438_v47, %v437_v46 }
 0x2df   :  { %v440_v49 = vrot.slane %v439_v48, 2 }
 0x2e1   :  { %v441_v50 = vadd.f32 %v440_v49, %v439_v48 }
 0x2e3   :  { %v442_v51 = vrot.slane %v441_v50, 1 }
 0x2e5   :  { %v443_v52 = vadd.f32 %v442_v51, %v441_v50 }
 0x2e7   :  { %597 = vrcp.f32 %v443_v52 }
 0x2f1   :  { %v598_v53 = vpop.eup %597 }
 0x2f2   :  { %v445_v54 = vmul.f32 %v598_v53, %v594_v42  ;;  %v446_v55 = vmul.f32 %v598_v53, %v596_v43 }
 0x2f4   :  { %447 = vst.msk [vmem:[#allocation2] sm:$0xff] %vm418_vm4, %v445_v54 }
 0x2f5   :  { %448 = vst.msk [vmem:[#allocation2 + $0x8] sm:$0x3] %vm420_vm3, %v446_v55 }
 0x2f6   :  { %610 = shalt.err (!%p607_p4)
}
 0x2f7   :  { %s611_s30 = scalar_lea.hbm %s816_s7, 256 }
 0x2f8   :  { %p612_p5 = scmp.ne.s32.totalorder %s816_s7, %s611_s30  ;;  %p615_p6 = scmp.lt.u32.totalorder %s611_s30, %s816_s7 }
 0x2fa   :  { %p617_p7 = pnand %p615_p6, %p612_p5 }
 0x2fc   :  { %620 = shalt.err (!%p617_p7)
}
 0x2fd   :  { %s628_s12 = smov 128   ;;  %s629_s0 = smov 8  }
 0x2fe   :  { %460 = dma.vmem_to_hbm [thread:$0]  %s455_s26, 256, %s816_s7, [#allocation3], %s628_s12, %s628_s12, %s629_s0  }
 0x2ff   :  { %621 = dma.done.wait [#allocation3], 256  }
 0x300   :  { %622 = vsyncadd [#allocation3], 4294967040 }
 0x301   :  { %464 = vsyncpa [#allocation3], 1 }

</bundles_post_ra>
